<compile_context>
chip_gen: v7x
topology: tpu7x:2x2x1
jax: 0.10.0
libtpu: 0.0.40
codegen_flags: <defaults>
</compile_context>

<pallas_src>
import functools

import jax
import jax.numpy as jnp
from jax.experimental import pallas as pl
from jax.experimental.pallas import tpu as pltpu

NUM_SEGMENTS = 4


def _vmem_capacity_bytes(default=64 << 20):
    """Physical VMEM per core; conservative (v7x-sized) default if query fails."""
    try:
        cap = getattr(pltpu.get_tpu_info(), "vmem_capacity_bytes", None)
        if cap:
            return int(cap)
    except Exception:
        pass
    return default


def _largest_aligned_divisor(dim, cap, align):
    """Largest t <= cap with dim % t == 0 and t % align == 0; falls back to dim.

    A tile equal to the full dim is always legal for BlockSpec, so the fallback
    is correct, but for awkward shapes it may exceed the VMEM tile budget.
    # TODO(synk): no ragged-tile path; shapes with no aligned divisor fall back
    # to the full dimension (vmem_limit_bytes is adapted below to cover it).
    """
    if dim <= cap:
        return dim
    t = (cap // align) * align
    while t >= align:
        if dim % t == 0:
            return t
        t -= align
    return dim


def _choose_tiles(b, c, hw, itemsize, tile_budget_bytes):
    """Pick (tc, th) for x blocks of shape (1, tc, th).

    Preference (per perf review): th == hw whenever a full-HW block fits the
    budget (contiguous HBM runs, reduction grid axis collapses to 1); otherwise
    keep tc minimal and make th the largest 128-multiple divisor that fits.
    Alignment: th needs 128 (lane) unless th == hw; tc needs the dtype's sublane
    packing (8 for 4-byte, 16 for 2-byte, 32 for 1-byte) unless tc == c.
    """
    sub_align = {4: 8, 2: 16, 1: 32}.get(itemsize, 8)
    budget_elems = max(1, tile_budget_bytes // itemsize)

    if hw <= budget_elems:
        th = hw
        tc = _largest_aligned_divisor(c, max(1, budget_elems // hw), sub_align)
    else:
        tc = sub_align if (c % sub_align == 0 and c > sub_align) else c
        th = _largest_aligned_divisor(hw, max(128, budget_elems // tc), 128)

    # v7x has 2 TensorCores: expose >= 2 blocks on the parallel axes when b == 1.
    if b == 1 and (c // tc) < 2:
        cand = _largest_aligned_divisor(c, tc // 2, sub_align)
        if cand < tc:
            tc = cand
    return tc, th


def _global_avg_pool_kernel(x_ref, o_ref, acc_ref, *, inv_hw):
    """Global average pool over the trailing HW axis, accumulated in f32.

    x_ref:   (1, tc, th)  native dtype (bf16/f32/...)
    o_ref:   (1, tc, 1)   x.dtype, written at the last reduction step
    acc_ref: (1, tc, 1)   f32 VMEM scratch, persistent across the HW grid axis
    """
    k = pl.program_id(2)

    @pl.when(k == 0)
    def _():
        acc_ref[...] = jnp.zeros_like(acc_ref)

    # Single pass over the tile; f32 accumulation (v5e has no bf16 VALU).
    acc_ref[...] += jnp.sum(x_ref[...], axis=-1, keepdims=True, dtype=jnp.float32)

    @pl.when(k == pl.num_programs(2) - 1)
    def _():
        o_ref[...] = (acc_ref[...] * inv_hw).astype(o_ref.dtype)


def global_stochastic_pooling(x, key, num_segments=NUM_SEGMENTS):
    """x: (B, C, H, W) NCHW.  Returns (o, counts); o is (B, C, 1, 1) like PyTorch."""
    b, c, h, w = x.shape
    hw = h * w
    itemsize = jnp.dtype(x.dtype).itemsize
    xr = x.reshape(b, c, hw)

    # --- Steps 1+2: Multinomial sampling (plain-JAX RNG glue; x is not read). ---
    # p == 1 for every (b, c) in the reference module, so the Multinomial is
    # uniform over the C channels; its sample equals S iid categorical draws.
    # TODO(synk): stochastic draws cannot bit-match PyTorch RNG; the sampling
    # distribution is identical.  (PyTorch would NaN if sum(x+1e-10) == 0; this
    # version silently keeps uniform probabilities in that degenerate case.)
    draws = jax.random.categorical(key, jnp.zeros((c,), jnp.float32),
                                   shape=(num_segments, b))               # (S, B)
    counts = jnp.sum(jax.nn.one_hot(draws, c, dtype=jnp.int32), axis=0)   # (B, C)

    # --- Step 3: single-pass global average pool (HBM-bandwidth bound). ---------
    vmem_cap = _vmem_capacity_bytes()
    tile_budget = min(16 << 20, vmem_cap // 4)        # ~16 MiB blocks on all gens
    tc, th = _choose_tiles(b, c, hw, itemsize, tile_budget)

    block_bytes = tc * th * itemsize
    # Double-buffered input + tiny output/scratch; stay within physical VMEM.
    vmem_limit = int(min(vmem_cap * 3 // 4,
                         max(48 << 20, 2 * block_bytes + (8 << 20))))

    cost = pl.CostEstimate(flops=b * c * hw, transcendentals=0,
                           bytes_accessed=xr.size * itemsize + b * c * itemsize)

    pooled = pl.pallas_call(
        functools.partial(_global_avg_pool_kernel, inv_hw=1.0 / float(hw)),
        out_shape=jax.ShapeDtypeStruct((b, c, 1), x.dtype),
        grid_spec=pltpu.PrefetchScalarGridSpec(
            num_scalar_prefetch=0,
            grid=(b, c // tc, hw // th),
            in_specs=[pl.BlockSpec((1, tc, th), lambda bi, j, k: (bi, j, k))],
            out_specs=pl.BlockSpec((1, tc, 1), lambda bi, j, k: (bi, j, 0)),
            scratch_shapes=[pltpu.VMEM((1, tc, 1), jnp.float32)],
        ),
        compiler_params=pltpu.CompilerParams(
            dimension_semantics=("parallel", "parallel", "arbitrary"),
            vmem_limit_bytes=vmem_limit),
        cost_estimate=cost,
    )(xr)

    # Epilogue on the tiny (B, C) result: the S disjoint segment masks collapse
    # to mean(x) * 1[count < S] (only channels that got all S draws are dropped).
    keep = (counts < num_segments).astype(x.dtype)                        # (B, C)
    o = pooled.reshape(b, c) * keep
    return o.reshape(b, c, 1, 1), counts


if __name__ == "__main__":
    key = jax.random.PRNGKey(0)
    k_x, k_mn = jax.random.split(key)

    B, C, H, W = 2, 4, 16, 16
    x = jax.random.normal(k_x, (B, C, H, W), dtype=jnp.float32)

    out, counts = global_stochastic_pooling(x, k_mn, num_segments=NUM_SEGMENTS)
    out = jax.block_until_ready(out)

    # Reference (pure JAX) using the same sampled counts:
    # o[b,c] = mean_{h,w} x[b,c] if counts[b,c] < num_segments else 0
    mean_ref = jnp.mean(x.reshape(B, C, -1), axis=-1)
    keep_ref = (counts < NUM_SEGMENTS).astype(x.dtype)
    ref = (mean_ref * keep_ref).reshape(B, C, 1, 1)

    assert out.shape == (B, C, 1, 1) and out.dtype == x.dtype
    assert jnp.allclose(out, ref, atol=1e-6, rtol=1e-5)
    assert int(jnp.sum(counts)) == B * NUM_SEGMENTS

    print("KERNEL_OK")
</pallas_src>

<mosaic_0001>
module attributes {stable_mosaic.version = 11 : i64} {
  func.func @_global_avg_pool_kernel(%arg0: i32, %arg1: i32, %arg2: i32, %arg3: memref<1x4x256xf32, #tpu.memory_space<vmem>>, %arg4: memref<1x4x1xf32, #tpu.memory_space<vmem>>, %arg5: memref<1x4x1xf32, #tpu.memory_space<vmem>>) attributes {dimension_semantics = [#tpu.dimension_semantics<parallel>, #tpu.dimension_semantics<parallel>, #tpu.dimension_semantics<arbitrary>], iteration_bounds = array<i64: 2, 1, 1>, scalar_prefetch = 0 : i64, scratch_operands = 1 : i64, tpu.core_type = #tpu.core_type<tc>, window_params = [{transform_indices = @transform_0, window_bounds = array<i64: 1, 4, 256>}, {transform_indices = @transform_1, window_bounds = array<i64: 1, 4, 1>}]} {
    %c0_i32 = arith.constant 0 : i32
    %0 = arith.cmpi eq, %arg2, %c0_i32 : i32
    %1 = arith.extui %0 : i1 to i32
    %c0_i32_0 = arith.constant 0 : i32
    %2 = arith.cmpi ne, %1, %c0_i32_0 : i32
    scf.if %2 {
      %cst_11 = arith.constant 0.000000e+00 : f32
      %12 = vector.broadcast %cst_11 : f32 to vector<1x4x1xf32>
      %c0_12 = arith.constant 0 : index
      %c0_13 = arith.constant 0 : index
      %c0_14 = arith.constant 0 : index
      %13 = vector.load %arg5[%c0_12, %c0_13, %c0_14] : memref<1x4x1xf32, #tpu.memory_space<vmem>>, vector<1x4x1xf32>
      tpu.vector_store %arg5[%c0_12, %c0_13, %c0_14], %12 {strides = array<i32>} : memref<1x4x1xf32, #tpu.memory_space<vmem>>, vector<1x4x1xf32>,
    } else {
    }
    %c0 = arith.constant 0 : index
    %c0_1 = arith.constant 0 : index
    %c0_2 = arith.constant 0 : index
    %3 = vector.load %arg5[%c0, %c0_1, %c0_2] : memref<1x4x1xf32, #tpu.memory_space<vmem>>, vector<1x4x1xf32>
    %c0_3 = arith.constant 0 : index
    %c0_4 = arith.constant 0 : index
    %c0_5 = arith.constant 0 : index
    %4 = vector.load %arg3[%c0_3, %c0_4, %c0_5] : memref<1x4x256xf32, #tpu.memory_space<vmem>>, vector<1x4x256xf32>
    %cst = arith.constant dense<0.000000e+00> : vector<1x4xf32>
    %5 = vector.multi_reduction <add>, %4, %cst [2] : vector<1x4x256xf32> to vector<1x4xf32>
    %6 = vector.shape_cast %5 : vector<1x4xf32> to vector<1x4x1xf32>
    %7 = arith.addf %3, %6 : vector<1x4x1xf32>
    %c0_6 = arith.constant 0 : index
    %c0_7 = arith.constant 0 : index
    %c0_8 = arith.constant 0 : index
    %8 = vector.load %arg5[%c0_6, %c0_7, %c0_8] : memref<1x4x1xf32, #tpu.memory_space<vmem>>, vector<1x4x1xf32>
    tpu.vector_store %arg5[%c0_6, %c0_7, %c0_8], %7 {strides = array<i32>} : memref<1x4x1xf32, #tpu.memory_space<vmem>>, vector<1x4x1xf32>,
    %c0_i32_9 = arith.constant 0 : i32
    %9 = arith.cmpi eq, %arg2, %c0_i32_9 : i32
    %10 = arith.extui %9 : i1 to i32
    %c0_i32_10 = arith.constant 0 : i32
    %11 = arith.cmpi ne, %10, %c0_i32_10 : i32
    scf.if %11 {
      %c0_11 = arith.constant 0 : index
      %c0_12 = arith.constant 0 : index
      %c0_13 = arith.constant 0 : index
      %12 = vector.load %arg5[%c0_11, %c0_12, %c0_13] : memref<1x4x1xf32, #tpu.memory_space<vmem>>, vector<1x4x1xf32>
      %cst_14 = arith.constant 3.906250e-03 : f32
      %13 = vector.broadcast %cst_14 : f32 to vector<1x4x1xf32>
      %14 = arith.mulf %12, %13 : vector<1x4x1xf32>
      %c0_15 = arith.constant 0 : index
      %c0_16 = arith.constant 0 : index
      %c0_17 = arith.constant 0 : index
      %15 = vector.load %arg4[%c0_15, %c0_16, %c0_17] : memref<1x4x1xf32, #tpu.memory_space<vmem>>, vector<1x4x1xf32>
      tpu.vector_store %arg4[%c0_15, %c0_16, %c0_17], %14 {strides = array<i32>} : memref<1x4x1xf32, #tpu.memory_space<vmem>>, vector<1x4x1xf32>,
    } else {
    }
    return
  }
  func.func @transform_0(%arg0: i32, %arg1: i32, %arg2: i32) -> (i32, i32, i32) {
    %c0_i32 = arith.constant 0 : i32
    return %arg0, %arg1, %arg2 : i32, i32, i32
  }
  func.func @transform_1(%arg0: i32, %arg1: i32, %arg2: i32) -> (i32, i32, i32) {
    %c0_i32 = arith.constant 0 : i32
    %c0_i32_0 = arith.constant 0 : i32
    return %arg0, %arg1, %c0_i32 : i32, i32, i32
  }
}

</mosaic_0001>

<bundles_post_ra>
// kernel: tpu_custom_call.1
= control target key start
LH: loop header
LB: loop body
LE: loop exit
PB: predicated region body
PF: predicated region fallthrough
CT: control target
= control target key end

     0   :  { %6 = vsyncpa [#allocation4], 0  ;;  %s578_s0 = inlined_call_operand.hbm [shape: f32[2,4,256], index: 0, kind: input, shape index: {}]   ;;  %s579_s1 = inlined_call_operand.vmem [shape: f32[2,4,1], index: 1, kind: output, shape index: {}]  }
   0x1   :  { %8 = vsyncpa [#allocation4 + $0x1], 0  ;;  %s450_s6 = smov 0   ;;  %s452_s7 = smov 0  }
   0x2   :  { %s454_s8 = smov 0   ;;  %s456_s9 = smov 0  }
   0x3   :  { %s458_s10 = smov 0   ;;  %s460_s11 = smov 0  }
   0x4 LB: > { %s286_s12 = sadd.s32 4294967295, %s436_s11   ;;  %s33_s13 = sadd.s32 1, %s432_s10  ;;  %s436_s11 = sphi %s460_s11, %s14_s11   ;;  %s432_s10 = sphi %s458_s10, %s589_s10   ;;  %s428_s9 = sphi %s456_s9, %s588_s9   ;;  %s424_s8 = sphi %s454_s8, %s587_s8   ;;  %s420_s7 = sphi %s452_s7, %s586_s7   ;;  %s416_s6 = sphi %s450_s6, %s585_s6  }
   0x5   : > { %p35_p0 = scmp.ge.s32.totalorder %s33_s13, 2  ;;  %s44_s14 = sadd.s32 1, %s424_s8 }
   0x6   : > { %p51_p1 = scmp.ne.s32.totalorder %s424_s8, %s420_s7  ;;  %p52_p2 = scmp.eq.s32.totalorder %s436_s11, 0 }
   0x7   : > { %s591_s13 = smov (%p35_p0, %s33_s13), 0  ;;  %p57_p4 = scmp.ne.s32.totalorder %s420_s7, %s416_s6 }
   0x8   : > { %p486_p3 = por %p52_p2, %p51_p1  ;;  %s37_s16 = ssub.s32 %s432_s10, %s591_s13 }
   0x9   : > { %p58_p5 = scmp.eq.s32.totalorder %s286_s12, 0  ;;  %p42_p6 = scmp.eq.s32.totalorder %s37_s16, 0 }
   0xa   : > { %p305_p8 = scmp.lt.s32.totalorder %s436_s11, 2  ;;  %s109_s19 = sand.u32 1, %s424_s8  }
   0xb   : > { %p493_p7 = por %p58_p5, %p57_p4  ;;  %s298_s20 = sshll.u32 %s432_s10, 7 }
   0xc   : > { %s499_s18 = scalar_select %p42_p6, %s424_s8, %s44_s14  }
   0xd   : > { %s290_s21 = sshll.u32 %s109_s19, 3  ;;  %s506_s24 = scalar_lea.hbm %s578_s0, %s298_s20 }
   0xe   : > { %s113_s25 = scalar_lea.vmem [#allocation3], %s290_s21  ;;  %p510_p9 = pnand %p305_p8, %p486_p3 }
   0xf   : > { %s125_s26 = sshll.u32 %s113_s25, 4  ;;  %s110_s28 = scalar_lea.sflag [#allocation4], %s109_s19  ;;  %s514_s26 = int_to_ptr.vmem [resolvable:$true] %s125_s26 }
  0x10   : > { %s356_s29 = scalar_lea.hbm %s506_s24, 128  ;;  %p358_p13 = pneg %p510_p9 }
  0x11   : > { %p357_p12 = scmp.ne.s32.totalorder %s506_s24, %s356_s29  ;;  %s361_s3 = scalar_lea.hbm %s578_s0, 256 }
  0x12   : > { %p362_p2 = scmp.lt.u32.totalorder %s506_s24, %s578_s0  ;;  %p363_p3 = scmp.lt.u32.totalorder %s361_s3, %s356_s29 }
  0x13   : > { %p359_p0 = pnand %p358_p13, %p357_p12  ;;  %p365_p5 = scmp.lt.u32.totalorder %s356_s29, %s506_s24 }
  0x14   : > { %p364_p4 = por %p363_p3, %p362_p2 }
  0x15   : > { %p360_p1 = pneg %p359_p0 }
  0x16   : > { %p366_p6 = por %p365_p5, %p364_p4 }
  0x18   : > { %p367_p8 = pnand %p366_p6, %p360_p1 }
  0x1a   : > { %370 = shalt.err (!%p367_p8)
}
  0x1b   : > { %s371_s6 = scalar_lea.vmem %s514_s26, 128  ;;  %s438_s12 = smov [#allocation3]  }
  0x1c   : > { %p372_p12 = scmp.ne.s32.totalorder %s514_s26, %s371_s6  ;;  %s376_s14 = sshll.u32 %s438_s12, 4  ;;  %s377_s14 = int_to_ptr.vmem [resolvable:$false] %s376_s14 }
  0x1d   : > { %s378_s15 = scalar_lea.vmem %s377_s14, 256  ;;  %p379_p11 = scmp.lt.s32.totalorder %s514_s26, %s377_s14 }
  0x1e   : > { %p374_p0 = pnand %p372_p12, %p358_p13  ;;  %p380_p2 = scmp.lt.s32.totalorder %s378_s15, %s371_s6 }
  0x20   : > { %p375_p10 = pneg %p374_p0  ;;  %p381_p3 = por %p380_p2, %p379_p11 }
  0x22   : > { %p382_p4 = pnand %p381_p3, %p375_p10 }
  0x24   : > { %385 = shalt.err (!%p382_p4)
}
  0x25   : > { %304 = dma.hbm_to_vmem [thread:$0]  (!%p510_p9), %s506_s24, 128, %s514_s26, %s110_s28  }
  0x26   : > { %p583_p1 = scmp.lt.s32.totalorder %s436_s11, 3  ;;  %p584_p5 = scmp.ge.s32.totalorder %s436_s11, 1 }
  0x28   : > { %p131_p13 = pnand %p584_p5, %p583_p1 }
  0x29   : > { %s136_s16 = sand.u32 (!%p131_p13), 1, %s420_s7  }
  0x2a   : > { %134 = sbr.rel (%p131_p13) target bundleno = 211 (0xd3), region = 24  ;;  %s294_s19 = sshll.u32 (!%p131_p13), %s136_s16, 3 }
  0x2b   : > { %s137_s20 = scalar_lea.sflag (!%p131_p13), [#allocation4], %s136_s16  ;;  %s140_s21 = scalar_lea.vmem (!%p131_p13), [#allocation3], %s294_s19 }
  0x31   : > { %411 = dma.done.wait (%p493_p7), %s137_s20, 128  }
  0x32   : > { %413 = vsyncadd (%p493_p7), %s137_s20, 4294967168  ;;  %vm173_vm0 = vcmask 3072   ;;  %v439_v0 = vmov 0.0   ;;  %vm180_vm1 = vcmask 1043456   ;;  %v176_v1 = vld [vmem:[%s140_s21] sm:$0xff]  ;;  %p162_p9 = scmp.lt.s32.totalorder %s428_s9, 1 }
  0x33   : > { %174 = vst.msk [vmem:[#allocation2] sm:$0xf] %vm173_vm0, %v439_v0  ;;  %v178_v2 = vcombine.high %v176_v1, %v176_v1  ;;  %v181_v3 = vsel %vm180_vm1, %v176_v1, 0.0 }
  0x34   : > { %s593_s9 = smov (!%p162_p9, %s428_s9), 1 }
  0x35   : > { %v182_v4 = vsel %vm180_vm1, %v178_v2, 0.0  ;;  %s295_s17 = sshll.u32 %s593_s9, 2 }
  0x36   : > { %v183_v5 = vadd.f32 %v182_v4, %v181_v3  ;;  %s168_s24 = scalar_lea.vmem %s579_s1, %s295_s17 }
  0x38   : > { %184 = vadd.xlane.f32.xlu0 %v183_v5 }
  0x3a   : > { %v175_v6 = vld [vmem:[#allocation2] sm:$0xf] }
  0xc5   : > { %v185_v7 = vpop.xlane.xlu0 %184 }
  0xc6   : > { %v186_v8 = vadd.f32 %v185_v7, %v175_v6 }
  0xc8   : > { %188 = vst.msk [vmem:[#allocation2] sm:$0xf] %vm173_vm0, %v186_v8 }
  0xcf   : > { %v192_v9 = vld [vmem:[#allocation2] sm:$0xf] }
  0xd0   : > { %v193_v10 = vmul.f32 0.00390625, %v192_v9 }
  0xd2   : > { %194 = vst.msk [vmem:[%s168_s24] sm:$0xf] %vm173_vm0, %v193_v10 }
  0xd3 PF: > { %s14_s11 = sadd.s32 1, %s436_s11   ;;  %s585_s6 = smov %s420_s7 }
  0xd4   : > { %p11_p7 = scmp.ge.s32.totalorder %s14_s11, 4   ;;  %s586_s7 = smov %s424_s8 }
  0xd5   : > { %s587_s8 = smov %s499_s18  ;;  %s588_s9 = smov %s432_s10 }
  0xd6   : > { %s589_s10 = smov %s591_s13  ;;  %13 = sbr.rel (!%p11_p7) target bundleno = 4 (0x4), region = 72 }
  0xdd   :  { %220 = vsyncpa [#allocation4], 1 }
  0xde   :  { %222 = vsyncpa [#allocation4 + $0x1], 1 }

</bundles_post_ra>
